<compile_context>
chip_gen: v7x
topology: tpu7x:2x2x1
jax: 0.10.0
libtpu: 0.0.40
codegen_flags: <defaults>
</compile_context>

<pallas_src>
import functools

import jax
import jax.numpy as jnp
from jax.experimental import pallas as pl
from jax.experimental.pallas import tpu as pltpu


def _pick_hw_tile(hw):
    """Lane-dim tile: >=512 when possible, multiple of 128, exact divisor preferred."""
    for t in (2048, 1024, 512, 256, 128):
        if hw % t == 0:
            return t
    if hw <= 2048:
        return hw          # full extent (allowed even when not 128-aligned)
    return 512             # multiple of 128; last chunk partial -> masked in phase 1


def _pick_c_tile(c, hw_tile, itemsize):
    """Sublane-dim tile: multiple of 8 (or full C), keep one x block <= ~2 MiB."""
    budget_rows = max(8, (2 << 20) // (hw_tile * max(itemsize, 4)))
    if c <= 8 or c % 8 != 0:
        return c           # full extent (allowed)
    return min(c, (budget_rows // 8) * 8)


def _channel_stats_kernel(x_ref, rm_ref, mean_ref, rm_new_ref, acc_ref,
                          *, inv_count, momentum, hw_total, hw_tile, mask_hw):
    """Phase 1: per-channel sum -> mean + running-mean update.

    x_ref:   (C_TILE, HW_TILE)  input tile (native dtype)
    rm_ref:  (C_TILE, 1)        running_mean in (f32)
    mean_ref, rm_new_ref: (C_TILE, 1) outputs (f32)
    acc_ref: (C_TILE, 1)        f32 accumulator scratch
    """
    n = pl.program_id(1)
    k = pl.program_id(2)

    @pl.when((n == 0) & (k == 0))
    def _init():
        acc_ref[...] = jnp.zeros_like(acc_ref)

    x = x_ref[...].astype(jnp.float32)
    if mask_hw:  # trace-time specialization: only emitted when needed
        rem = hw_total - k * hw_tile
        lane = jax.lax.broadcasted_iota(jnp.int32, x.shape, 1)
        x = jnp.where(lane < rem, x, 0.0)
    acc_ref[...] += jnp.sum(x, axis=1, keepdims=True)

    @pl.when((n == pl.num_programs(1) - 1) & (k == pl.num_programs(2) - 1))
    def _finalize():
        avg = acc_ref[...] * inv_count               # divide by true N*H*W
        mean_ref[...] = avg
        rm_new_ref[...] = (1.0 - momentum) * rm_ref[...] + momentum * avg


def _normalize_kernel(x_ref, mean_ref, bias_ref, out_ref):
    """Phase 2: out = x - mean + bias (per-channel broadcast over lanes)."""
    x = x_ref[...].astype(jnp.float32)               # (C_TILE, HW_TILE)
    out_ref[...] = (x - mean_ref[...] + bias_ref[...]).astype(out_ref.dtype)


def mean_only_batchnorm(x_nchw, bias, running_mean, momentum=0.1):
    """Training-mode forward of MeanOnlyBatchNorm.

    Args:
      x_nchw:       (N, C, H, W)
      bias:         (C,)
      running_mean: (C,)
      momentum:     python float
    Returns:
      out (N, C, H, W) same dtype as input, new_running_mean (C,) float32
    """
    N, C, H, W = x_nchw.shape
    HW = H * W
    itemsize = jnp.dtype(x_nchw.dtype).itemsize

    x3 = x_nchw.reshape(N, C, HW)                    # free view, no transpose
    bias_c1 = bias.reshape(C, 1).astype(jnp.float32)
    rm_c1 = running_mean.reshape(C, 1).astype(jnp.float32)

    hw_tile = _pick_hw_tile(HW)
    c_tile = _pick_c_tile(C, hw_tile, itemsize)
    c_blocks = pl.cdiv(C, c_tile)
    hw_blocks = pl.cdiv(HW, hw_tile)
    grid = (c_blocks, N, hw_blocks)

    x_blk_bytes = c_tile * hw_tile * itemsize
    # phase 1: double-buffered input + tiny per-channel blocks/scratch
    vmem_p1 = int(min(32 << 20, max(16 << 20, 3 * x_blk_bytes + (2 << 20))))
    # phase 2: double-buffered input + double-buffered output
    vmem_p2 = int(min(32 << 20, max(16 << 20, 4 * x_blk_bytes + (2 << 20))))

    x_spec = pl.BlockSpec((None, c_tile, hw_tile), lambda c, n, k: (n, c, k))
    chan_spec = pl.BlockSpec((c_tile, 1), lambda c, n, k: (c, 0))

    # ---- phase 1: per-channel mean + running-mean update -------------------
    phase1 = functools.partial(
        _channel_stats_kernel,
        inv_count=float(1.0 / (N * HW)),
        momentum=float(momentum),
        hw_total=HW,
        hw_tile=hw_tile,
        mask_hw=(HW % hw_tile != 0),
    )
    mean_c1, rm_new_c1 = pl.pallas_call(
        phase1,
        out_shape=(
            jax.ShapeDtypeStruct((C, 1), jnp.float32),
            jax.ShapeDtypeStruct((C, 1), jnp.float32),
        ),
        grid_spec=pltpu.PrefetchScalarGridSpec(
            num_scalar_prefetch=0,
            grid=grid,
            in_specs=[x_spec, chan_spec],
            out_specs=(chan_spec, chan_spec),
            scratch_shapes=[pltpu.VMEM((c_tile, 1), jnp.float32)],
        ),
        compiler_params=pltpu.CompilerParams(
            dimension_semantics=("parallel", "arbitrary", "arbitrary"),
            vmem_limit_bytes=vmem_p1,
        ),
    )(x3, rm_c1)

    # ---- phase 2: out = x - mean + bias -------------------------------------
    out3 = pl.pallas_call(
        _normalize_kernel,
        out_shape=jax.ShapeDtypeStruct((N, C, HW), x_nchw.dtype),
        grid_spec=pltpu.PrefetchScalarGridSpec(
            num_scalar_prefetch=0,
            grid=grid,
            in_specs=[x_spec, chan_spec, chan_spec],
            out_specs=x_spec,
        ),
        compiler_params=pltpu.CompilerParams(
            dimension_semantics=("parallel", "parallel", "parallel"),
            vmem_limit_bytes=vmem_p2,
        ),
    )(x3, mean_c1, bias_c1)

    return out3.reshape(N, C, H, W), rm_new_c1.reshape(C)


if __name__ == "__main__":
    key = jax.random.PRNGKey(0)
    N, C, H, W = 2, 4, 16, 16
    momentum = 0.1

    x = jax.random.normal(key, (N, C, H, W), dtype=jnp.float32)
    # Parameters as in __init__: bias = zeros(C), running_mean buffer = zeros(C).
    # Use small non-zero values to exercise the adds / running-mean update.
    bias = jnp.arange(C, dtype=jnp.float32) * 0.01
    running_mean = jnp.arange(C, dtype=jnp.float32) * 0.05

    out, rm_new = mean_only_batchnorm(x, bias, running_mean, momentum)
    out = jax.block_until_ready(out)
    rm_new = jax.block_until_ready(rm_new)

    # reference check in plain JAX (training-mode semantics)
    avg_ref = jnp.mean(x, axis=(0, 2, 3))
    out_ref = x - avg_ref.reshape(1, C, 1, 1) + bias.reshape(1, C, 1, 1)
    rm_ref = (1.0 - momentum) * running_mean + momentum * avg_ref
    assert jnp.allclose(out, out_ref, atol=1e-5), "output mismatch"
    assert jnp.allclose(rm_new, rm_ref, atol=1e-6), "running_mean mismatch"

    # TODO(synk): eval-mode branch (avg = running_mean) can reuse phase 2 alone.
    print("KERNEL_OK")
</pallas_src>

<mosaic_0001>
module attributes {stable_mosaic.version = 11 : i64} {
  func.func @_channel_stats_kernel(%arg0: i32, %arg1: i32, %arg2: i32, %arg3: memref<1x4x256xf32, #tpu.memory_space<vmem>>, %arg4: memref<4x1xf32, #tpu.memory_space<vmem>>, %arg5: memref<4x1xf32, #tpu.memory_space<vmem>>, %arg6: memref<4x1xf32, #tpu.memory_space<vmem>>, %arg7: memref<4x1xf32, #tpu.memory_space<vmem>>) attributes {dimension_semantics = [#tpu.dimension_semantics<parallel>, #tpu.dimension_semantics<arbitrary>, #tpu.dimension_semantics<arbitrary>], iteration_bounds = array<i64: 1, 2, 1>, scalar_prefetch = 0 : i64, scratch_operands = 1 : i64, tpu.core_type = #tpu.core_type<tc>, window_params = [{transform_indices = @transform_0, window_bounds = array<i64: 1, 4, 256>}, {transform_indices = @transform_1, window_bounds = array<i64: 4, 1>}, {transform_indices = @transform_2, window_bounds = array<i64: 4, 1>}, {transform_indices = @transform_3, window_bounds = array<i64: 4, 1>}]} {
    %c0_i32 = arith.constant 0 : i32
    %0 = arith.cmpi eq, %arg1, %c0_i32 : i32
    %c0_i32_0 = arith.constant 0 : i32
    %1 = arith.cmpi eq, %arg2, %c0_i32_0 : i32
    %2 = arith.andi %0, %1 : i1
    %3 = arith.extui %2 : i1 to i32
    %c0_i32_1 = arith.constant 0 : i32
    %4 = arith.cmpi ne, %3, %c0_i32_1 : i32
    scf.if %4 {
      %cst_10 = arith.constant 0.000000e+00 : f32
      %17 = vector.broadcast %cst_10 : f32 to vector<4x1xf32>
      %c0_11 = arith.constant 0 : index
      %c0_12 = arith.constant 0 : index
      %18 = vector.load %arg7[%c0_11, %c0_12] : memref<4x1xf32, #tpu.memory_space<vmem>>, vector<4x1xf32>
      tpu.vector_store %arg7[%c0_11, %c0_12], %17 {strides = array<i32>} : memref<4x1xf32, #tpu.memory_space<vmem>>, vector<4x1xf32>,
    } else {
    }
    %c0 = arith.constant 0 : index
    %c0_2 = arith.constant 0 : index
    %c0_3 = arith.constant 0 : index
    %5 = vector.load %arg3[%c0, %c0_2, %c0_3] : memref<1x4x256xf32, #tpu.memory_space<vmem>>, vector<1x4x256xf32>
    %6 = vector.shape_cast %5 : vector<1x4x256xf32> to vector<4x256xf32>
    %c0_4 = arith.constant 0 : index
    %c0_5 = arith.constant 0 : index
    %7 = vector.load %arg7[%c0_4, %c0_5] : memref<4x1xf32, #tpu.memory_space<vmem>>, vector<4x1xf32>
    %cst = arith.constant dense<0.000000e+00> : vector<4xf32>
    %8 = vector.multi_reduction <add>, %6, %cst [1] : vector<4x256xf32> to vector<4xf32>
    %9 = vector.shape_cast %8 : vector<4xf32> to vector<4x1xf32>
    %10 = arith.addf %7, %9 : vector<4x1xf32>
    %c0_6 = arith.constant 0 : index
    %c0_7 = arith.constant 0 : index
    %11 = vector.load %arg7[%c0_6, %c0_7] : memref<4x1xf32, #tpu.memory_space<vmem>>, vector<4x1xf32>
    tpu.vector_store %arg7[%c0_6, %c0_7], %10 {strides = array<i32>} : memref<4x1xf32, #tpu.memory_space<vmem>>, vector<4x1xf32>,
    %c1_i32 = arith.constant 1 : i32
    %12 = arith.cmpi eq, %arg1, %c1_i32 : i32
    %c0_i32_8 = arith.constant 0 : i32
    %13 = arith.cmpi eq, %arg2, %c0_i32_8 : i32
    %14 = arith.andi %12, %13 : i1
    %15 = arith.extui %14 : i1 to i32
    %c0_i32_9 = arith.constant 0 : i32
    %16 = arith.cmpi ne, %15, %c0_i32_9 : i32
    scf.if %16 {
      %c0_10 = arith.constant 0 : index
      %c0_11 = arith.constant 0 : index
      %17 = vector.load %arg7[%c0_10, %c0_11] : memref<4x1xf32, #tpu.memory_space<vmem>>, vector<4x1xf32>
      %cst_12 = arith.constant 0.001953125 : f32
      %18 = vector.broadcast %cst_12 : f32 to vector<4x1xf32>
      %19 = arith.mulf %17, %18 : vector<4x1xf32>
      %c0_13 = arith.constant 0 : index
      %c0_14 = arith.constant 0 : index
      %20 = vector.load %arg5[%c0_13, %c0_14] : memref<4x1xf32, #tpu.memory_space<vmem>>, vector<4x1xf32>
      tpu.vector_store %arg5[%c0_13, %c0_14], %19 {strides = array<i32>} : memref<4x1xf32, #tpu.memory_space<vmem>>, vector<4x1xf32>,
      %c0_15 = arith.constant 0 : index
      %c0_16 = arith.constant 0 : index
      %21 = vector.load %arg4[%c0_15, %c0_16] : memref<4x1xf32, #tpu.memory_space<vmem>>, vector<4x1xf32>
      %cst_17 = arith.constant 0.899999976 : f32
      %22 = vector.broadcast %cst_17 : f32 to vector<4x1xf32>
      %23 = arith.mulf %22, %21 : vector<4x1xf32>
      %cst_18 = arith.constant 1.000000e-01 : f32
      %24 = vector.broadcast %cst_18 : f32 to vector<4x1xf32>
      %25 = arith.mulf %24, %19 : vector<4x1xf32>
      %26 = arith.addf %23, %25 : vector<4x1xf32>
      %c0_19 = arith.constant 0 : index
      %c0_20 = arith.constant 0 : index
      %27 = vector.load %arg6[%c0_19, %c0_20] : memref<4x1xf32, #tpu.memory_space<vmem>>, vector<4x1xf32>
      tpu.vector_store %arg6[%c0_19, %c0_20], %26 {strides = array<i32>} : memref<4x1xf32, #tpu.memory_space<vmem>>, vector<4x1xf32>,
    } else {
    }
    return
  }
  func.func @transform_0(%arg0: i32, %arg1: i32, %arg2: i32) -> (i32, i32, i32) {
    %c0_i32 = arith.constant 0 : i32
    return %arg1, %arg0, %arg2 : i32, i32, i32
  }
  func.func @transform_1(%arg0: i32, %arg1: i32, %arg2: i32) -> (i32, i32) {
    %c0_i32 = arith.constant 0 : i32
    %c0_i32_0 = arith.constant 0 : i32
    return %arg0, %c0_i32 : i32, i32
  }
  func.func @transform_2(%arg0: i32, %arg1: i32, %arg2: i32) -> (i32, i32) {
    %c0_i32 = arith.constant 0 : i32
    %c0_i32_0 = arith.constant 0 : i32
    return %arg0, %c0_i32 : i32, i32
  }
  func.func @transform_3(%arg0: i32, %arg1: i32, %arg2: i32) -> (i32, i32) {
    %c0_i32 = arith.constant 0 : i32
    %c0_i32_0 = arith.constant 0 : i32
    return %arg0, %c0_i32 : i32, i32
  }
}

</mosaic_0001>

<bundles_post_ra>
// kernel: tpu_custom_call.1
= control target key start
LH: loop header
LB: loop body
LE: loop exit
PB: predicated region body
PF: predicated region fallthrough
CT: control target
= control target key end

     0   :  { %9 = vsyncpa [#allocation4], 0  ;;  %s709_s0 = inlined_call_operand.hbm [shape: f32[2,4,256], index: 0, kind: input, shape index: {}]   ;;  %s710_s1 = inlined_call_operand.vmem [shape: f32[4,1], index: 1, kind: input, shape index: {}]   ;;  %s711_s2 = inlined_call_operand.vmem [shape: f32[4,1], index: 2, kind: output, shape index: {0}]   ;;  %s712_s3 = inlined_call_operand.vmem [shape: f32[4,1], index: 3, kind: output, shape index: {1}]  }
   0x1   :  { %11 = vsyncpa [#allocation4 + $0x1], 0  ;;  %s578_s12 = smov 0   ;;  %s580_s13 = smov 0  }
   0x2   :  { %s582_s14 = smov 0   ;;  %s584_s15 = smov 0  }
   0x3   :  { %s586_s16 = smov 0   ;;  %s588_s17 = smov 0  }
   0x4 LB: > { %s399_s18 = sadd.s32 4294967295, %s554_s17   ;;  %s32_s19 = sadd.s32 1, %s550_s16  ;;  %s554_s17 = sphi %s588_s17, %s17_s17   ;;  %s550_s16 = sphi %s586_s16, %s722_s16   ;;  %s546_s15 = sphi %s584_s15, %s721_s15   ;;  %s542_s14 = sphi %s582_s14, %s720_s14   ;;  %s538_s13 = sphi %s580_s13, %s719_s13   ;;  %s534_s12 = sphi %s578_s12, %s718_s12  }
   0x5   : > { %p34_p0 = scmp.ge.s32.totalorder %s32_s19, 2  ;;  %s47_s20 = sadd.s32 1, %s542_s14 }
   0x6   : > { %p54_p1 = scmp.ne.s32.totalorder %s542_s14, %s538_s13  ;;  %p55_p2 = scmp.eq.s32.totalorder %s554_s17, 0 }
   0x7   : > { %s724_s19 = smov (%p34_p0, %s32_s19), 0  ;;  %p60_p4 = scmp.ne.s32.totalorder %s538_s13, %s534_s12 }
   0x8   : > { %p614_p3 = por %p55_p2, %p54_p1  ;;  %s40_s22 = ssub.s32 %s550_s16, %s724_s19 }
   0x9   : > { %p61_p5 = scmp.eq.s32.totalorder %s399_s18, 0  ;;  %p45_p6 = scmp.eq.s32.totalorder %s40_s22, 0 }
   0xa   : > { %p423_p8 = scmp.lt.s32.totalorder %s554_s17, 2  ;;  %s169_s25 = sand.u32 1, %s542_s14  }
   0xb   : > { %p621_p7 = por %p61_p5, %p60_p4  ;;  %s414_s26 = sshll.u32 %s550_s16, 7 }
   0xc   : > { %s627_s24 = scalar_select %p45_p6, %s542_s14, %s47_s20  }
   0xd   : > { %s403_s27 = sshll.u32 %s169_s25, 3  ;;  %s634_s30 = scalar_lea.hbm %s709_s0, %s414_s26 }
   0xe   : > { %s173_s4 = scalar_lea.vmem [#allocation3], %s403_s27  ;;  %p638_p9 = pnand %p423_p8, %p614_p3 }
   0xf   : > { %s185_s5 = sshll.u32 %s173_s4, 4  ;;  %s170_s7 = scalar_lea.sflag [#allocation4], %s169_s25  ;;  %s642_s5 = int_to_ptr.vmem [resolvable:$true] %s185_s5 }
  0x10   : > { %s474_s8 = scalar_lea.hbm %s634_s30, 128  ;;  %p476_p13 = pneg %p638_p9 }
  0x11   : > { %p475_p12 = scmp.ne.s32.totalorder %s634_s30, %s474_s8  ;;  %s479_s11 = scalar_lea.hbm %s709_s0, 256 }
  0x12   : > { %p480_p2 = scmp.lt.u32.totalorder %s634_s30, %s709_s0  ;;  %p481_p3 = scmp.lt.u32.totalorder %s479_s11, %s474_s8 }
  0x13   : > { %p477_p0 = pnand %p476_p13, %p475_p12  ;;  %p483_p5 = scmp.lt.u32.totalorder %s474_s8, %s634_s30 }
  0x14   : > { %p482_p4 = por %p481_p3, %p480_p2 }
  0x15   : > { %p478_p1 = pneg %p477_p0 }
  0x16   : > { %p484_p6 = por %p483_p5, %p482_p4 }
  0x18   : > { %p485_p8 = pnand %p484_p6, %p478_p1 }
  0x1a   : > { %488 = shalt.err (!%p485_p8)
}
  0x1b   : > { %s489_s20 = scalar_lea.vmem %s642_s5, 128  ;;  %s556_s21 = smov [#allocation3]  }
  0x1c   : > { %p490_p12 = scmp.ne.s32.totalorder %s642_s5, %s489_s20  ;;  %s494_s22 = sshll.u32 %s556_s21, 4  ;;  %s495_s22 = int_to_ptr.vmem [resolvable:$false] %s494_s22 }
  0x1d   : > { %s496_s25 = scalar_lea.vmem %s495_s22, 256  ;;  %p497_p11 = scmp.lt.s32.totalorder %s642_s5, %s495_s22 }
  0x1e   : > { %p492_p0 = pnand %p490_p12, %p476_p13  ;;  %p498_p2 = scmp.lt.s32.totalorder %s496_s25, %s489_s20 }
  0x20   : > { %p493_p10 = pneg %p492_p0  ;;  %p499_p3 = por %p498_p2, %p497_p11 }
  0x22   : > { %p500_p4 = pnand %p499_p3, %p493_p10 }
  0x24   : > { %503 = shalt.err (!%p500_p4)
}
  0x25   : > { %422 = dma.hbm_to_vmem [thread:$0]  (!%p638_p9), %s634_s30, 128, %s642_s5, %s170_s7  }
  0x26   : > { %p716_p1 = scmp.lt.s32.totalorder %s554_s17, 3  ;;  %p717_p5 = scmp.ge.s32.totalorder %s554_s17, 1 }
  0x28   : > { %p191_p13 = pnand %p717_p5, %p716_p1 }
  0x29   : > { %s196_s26 = sand.u32 (!%p191_p13), 1, %s538_s13  }
  0x2a   : > { %194 = sbr.rel (%p191_p13) target bundleno = 224 (0xe0), region = 28  ;;  %s407_s27 = sshll.u32 (!%p191_p13), %s196_s26, 3 }
  0x2b   : > { %s197_s28 = scalar_lea.sflag (!%p191_p13), [#allocation4], %s196_s26  ;;  %s200_s29 = scalar_lea.vmem (!%p191_p13), [#allocation3], %s407_s27 }
  0x31   : > { %529 = dma.done.wait (%p621_p7), %s197_s28, 128  }
  0x32   : > { %531 = vsyncadd (%p621_p7), %s197_s28, 4294967168  ;;  %p243_p10 = scmp.eq.s32.totalorder %s546_s15, 0 }
  0x33   : > { %vm249_vm0 = vcmask (%p243_p10), 3072   ;;  %v557_v0 = vmov (%p243_p10), 0.0  }
  0x34   : > { %248 = sbr.rel (!%p243_p10) target bundleno = 59 (0x3b), region = 36  ;;  %250 = vst.msk [vmem:[#allocation2] sm:$0xf] (%p243_p10), %vm249_vm0, %v557_v0 }
  0x3b PF: > { %v251_v1 = vld [vmem:[%s200_s29] sm:$0xff]  ;;  %vm256_vm1 = vcmask 1043456   ;;  %p265_p9 = scmp.eq.s32.totalorder %s546_s15, 1  ;;  %v252_v6 = vld [vmem:[#allocation2] sm:$0xf]  ;;  %vm263_vm2 = vcmask 3072  }
  0x3c   : > { %v254_v2 = vcombine.high %v251_v1, %v251_v1  ;;  %v257_v3 = vsel %vm256_vm1, %v251_v1, 0.0  ;;  %v273_v10 = vld [vmem:[%s710_s1] sm:$0xf] (%p265_p9) }
  0x3d   : > { %v274_v12 = vmul.f32 (%p265_p9), 0.9, %v273_v10 }
  0x3e   : > { %v258_v4 = vsel %vm256_vm1, %v254_v2, 0.0 }
  0x3f   : > { %v259_v5 = vadd.f32 %v258_v4, %v257_v3 }
  0x41   : > { %260 = vadd.xlane.f32.xlu0 %v259_v5 }
  0xcb   : > { %269 = sbr.rel (!%p265_p9) target bundleno = 224 (0xe0), region = 40 }
  0xce   : > { %v261_v7 = vpop.xlane.xlu0 %260 }
  0xcf   : > { %v262_v8 = vadd.f32 %v261_v7, %v252_v6 }
  0xd1   : > { %264 = vst.msk [vmem:[#allocation2] sm:$0xf] %vm263_vm2, %v262_v8 }
  0xd8   : > { %v270_v9 = vld [vmem:[#allocation2] sm:$0xf] }
  0xd9   : > { %v271_v11 = vmul.f32 0.001953125, %v270_v9 }
  0xdb   : > { %272 = vst.msk [vmem:[%s711_s2] sm:$0xf] %vm263_vm2, %v271_v11  ;;  %v275_v13 = vmul.f32 0.1, %v271_v11 }
  0xdd   : > { %v276_v14 = vadd.f32 %v275_v13, %v274_v12 }
  0xdf   : > { %277 = vst.msk [vmem:[%s712_s3] sm:$0xf] %vm263_vm2, %v276_v14 }
  0xe0 PF: > { %s17_s17 = sadd.s32 1, %s554_s17   ;;  %s718_s12 = smov %s538_s13 }
  0xe1   : > { %p14_p7 = scmp.ge.s32.totalorder %s17_s17, 4   ;;  %s719_s13 = smov %s542_s14 }
  0xe2   : > { %s720_s14 = smov %s627_s24  ;;  %s721_s15 = smov %s550_s16 }
  0xe3   : > { %s722_s16 = smov %s724_s19  ;;  %16 = sbr.rel (!%p14_p7) target bundleno = 4 (0x4), region = 91 }
  0xea   :  { %311 = vsyncpa [#allocation4], 1 }
  0xeb   :  { %313 = vsyncpa [#allocation4 + $0x1], 1 }

</bundles_post_ra>
